<compile_context>
chip_gen: v7x
topology: tpu7x:2x2x1
jax: 0.10.0
libtpu: 0.0.40
codegen_flags: <defaults>
</compile_context>

<pallas_src>
import numpy as np
import jax
import jax.numpy as jnp
from jax.experimental import pallas as pl
from jax.experimental.pallas import tpu as pltpu


# ---------------------------------------------------------------------------
# Helpers
# ---------------------------------------------------------------------------
def _largest_divisor_leq(n, cap):
    cap = max(1, min(n, int(cap)))
    for d in range(cap, 0, -1):
        if n % d == 0:
            return d
    return 1


def _pick_row_tile(H, W, C, Cout, itemsize):
    # ~4 MiB working-set budget per grid step:
    #   double-buffered output tile (2TH, 2W, Cout) + 4 f32 phase accumulators
    #   (TH*W, Cout) + 3 column-shifted windows (TH+2, W, C).
    per_row = W * (8 * Cout * itemsize + 16 * Cout + 3 * C * itemsize)
    cap = (4 * 1024 * 1024) // max(per_row, 1)
    return _largest_divisor_leq(H, cap)


def _pick_channel_tile(C, H, W, itemsize):
    per_chan = H * W * (10 * itemsize + 16)
    cap = (4 * 1024 * 1024) // max(per_chan, 1)
    return _largest_divisor_leq(C, cap)


# ---------------------------------------------------------------------------
# Kernels
# ---------------------------------------------------------------------------
def _upsample_conv_kernel(x_ref, wp_ref, b_ref, o_ref):
    """Fused nearest-2x upsample + 3x3 conv via phase decomposition.

    x_ref : (H, W, C)          full input image (resident across row tiles)
    wp_ref: (16, C, Cout)      phase-decomposed 3x3 weights (input dtype)
    b_ref : (1, Cout)          f32 bias
    o_ref : (2*TH, 2*W, Cout)  output row tile
    """
    H, W, C = x_ref.shape
    TH = o_ref.shape[0] // 2
    Cout = o_ref.shape[2]

    r = pl.program_id(1)
    n_rt = pl.num_programs(1)
    row0 = pl.multiple_of(r * TH, TH)

    # (TH + 2)-row window with 1-row halos; halo rows are clamped loads that are
    # zeroed (gate-multiply) at the image boundary.
    xt = x_ref[pl.ds(row0, TH), :, :]                                  # (TH, W, C)
    top = x_ref[pl.ds(jnp.maximum(row0 - 1, 0), 1), :, :]              # (1, W, C)
    bot = x_ref[pl.ds(jnp.minimum(row0 + TH, H - 1), 1), :, :]         # (1, W, C)
    top = top * jnp.where(r > 0, 1.0, 0.0).astype(top.dtype)
    bot = bot * jnp.where(r < n_rt - 1, 1.0, 0.0).astype(bot.dtype)
    win = jnp.concatenate([top, xt, bot], axis=0)                      # (TH+2, W, C)

    # Three column-shifted variants of the window; variant ct holds x[., j+ct-1]
    # (zero outside the image).
    zcol = jnp.zeros((TH + 2, 1, C), win.dtype)
    variants = (
        jnp.concatenate([zcol, win[:, :W - 1, :]], axis=1),            # col offset -1
        win,                                                           # col offset  0
        jnp.concatenate([win[:, 1:, :], zcol], axis=1),                # col offset +1
    )

    # f32 accumulator seeded with the bias (hoisted; reused by all 4 phases).
    bias_full = jnp.broadcast_to(b_ref[...].astype(jnp.float32), (TH * W, Cout))

    phases = []
    for dh in range(2):
        for dw in range(2):
            acc = bias_full
            for ta in range(2):          # row tap of this phase
                for tb in range(2):      # col tap of this phase
                    p = ((dh * 2 + dw) * 2 + ta) * 2 + tb
                    tap = variants[dw + tb][dh + ta:dh + ta + TH]      # (TH, W, C)
                    acc = acc + jnp.dot(tap.reshape(TH * W, C), wp_ref[p],
                                        preferred_element_type=jnp.float32)
            phases.append(acc.reshape(TH, W, Cout))
    y00, y01, y10, y11 = phases

    # Assemble the (2TH, 2W, Cout) tile in-register (lane-dense single store).
    even = jnp.stack([y00, y01], axis=2).reshape(TH, 2 * W, Cout)      # rows 2i
    odd = jnp.stack([y10, y11], axis=2).reshape(TH, 2 * W, Cout)       # rows 2i+1
    out = jnp.stack([even, odd], axis=1).reshape(2 * TH, 2 * W, Cout)
    o_ref[...] = out.astype(o_ref.dtype)


def _upsample_only_kernel(x_ref, e_ref, o_ref):
    """Nearest 2x upsample directly in NCHW layout (with_conv=False path).

    x_ref: (CT, H, W) channel tile;  e_ref: (W, 2W) 0/1 expansion matrix;
    o_ref: (CT, 2H, 2W)
    """
    CT, H, W = x_ref.shape
    x = x_ref[...]
    # duplicate rows (sublane-merge reshape, lane dim W unchanged)
    xh = jnp.broadcast_to(x[:, :, None, :], (CT, H, 2, W)).reshape(CT, 2 * H, W)
    # duplicate columns on the MXU: out[., 2w] = out[., 2w+1] = xh[., w]
    y = jnp.dot(xh.reshape(CT * 2 * H, W), e_ref[...],
                preferred_element_type=jnp.float32)
    o_ref[...] = y.reshape(CT, 2 * H, 2 * W).astype(o_ref.dtype)


# ---------------------------------------------------------------------------
# Wrapper (NCHW in / NCHW out, like the PyTorch module)
# ---------------------------------------------------------------------------
def upsamplepp_forward(x_nchw, weight_oihw=None, bias=None, *, with_conv=False,
                       row_tile=None, channel_tile=None):
    B, C, H, W = x_nchw.shape
    dtype = x_nchw.dtype
    itemsize = jnp.dtype(dtype).itemsize

    if not with_conv:
        # Pure nearest 2x upsample, done in NCHW (no boundary transposes).
        CT = channel_tile if channel_tile is not None else _pick_channel_tile(
            C, H, W, itemsize)
        if C % CT != 0:
            raise ValueError("channel_tile must divide C")
        expand = jnp.repeat(jnp.eye(W, dtype=jnp.float32), 2, axis=1).astype(dtype)
        return pl.pallas_call(
            _upsample_only_kernel,
            out_shape=jax.ShapeDtypeStruct((B, C, 2 * H, 2 * W), dtype),
            grid_spec=pltpu.PrefetchScalarGridSpec(
                num_scalar_prefetch=0,
                grid=(B, C // CT),
                in_specs=[
                    pl.BlockSpec((None, CT, H, W), lambda b, c: (b, c, 0, 0)),
                    pl.BlockSpec((W, 2 * W), lambda b, c: (0, 0)),
                ],
                out_specs=pl.BlockSpec((None, CT, 2 * H, 2 * W),
                                       lambda b, c: (b, c, 0, 0))),
            compiler_params=pltpu.CompilerParams(
                dimension_semantics=("parallel", "parallel")),
        )(x_nchw, expand)

    if weight_oihw is None or bias is None:
        raise ValueError("with_conv=True requires weight and bias")
    Cout = weight_oihw.shape[0]

    # NHWC for the channel contraction (C on the 128-lane axis).
    x = jnp.transpose(x_nchw, (0, 2, 3, 1))

    # Host-side phase decomposition of the 3x3 kernel.
    # A[dh, a, kh] = 1 iff kernel row kh of the 3x3 conv contributes to row-tap a
    # of output row parity dh (a=0 -> offset dh-1, a=1 -> offset dh).  Same for
    # columns.  Wp[dh, dw, a, b] = sum_{kh,kw} A[dh,a,kh] A[dw,b,kw] w[kh,kw].
    wh = jnp.transpose(weight_oihw, (2, 3, 1, 0)).astype(jnp.float32)   # (3,3,C,Cout)
    A = jnp.array([[[1., 0., 0.], [0., 1., 1.]],
                   [[1., 1., 0.], [0., 0., 1.]]], jnp.float32)          # (2,2,3)
    wp = jnp.einsum('xah,ybk,hkio->xyabio', A, A, wh)                   # (2,2,2,2,C,Cout)
    wp = wp.reshape(16, C, Cout).astype(dtype)
    b2 = bias.reshape(1, Cout).astype(jnp.float32)

    TH = row_tile if row_tile is not None else _pick_row_tile(H, W, C, Cout, itemsize)
    if H % TH != 0:
        raise ValueError("row_tile must divide H")
    R = H // TH

    out = pl.pallas_call(
        _upsample_conv_kernel,
        out_shape=jax.ShapeDtypeStruct((B, 2 * H, 2 * W, Cout), dtype),
        grid_spec=pltpu.PrefetchScalarGridSpec(
            num_scalar_prefetch=0,
            grid=(B, R),
            in_specs=[
                pl.BlockSpec((None, H, W, C), lambda b, r: (b, 0, 0, 0)),
                pl.BlockSpec((16, C, Cout), lambda b, r: (0, 0, 0)),
                pl.BlockSpec((1, Cout), lambda b, r: (0, 0)),
            ],
            out_specs=pl.BlockSpec((None, 2 * TH, 2 * W, Cout),
                                   lambda b, r: (b, r, 0, 0))),
        compiler_params=pltpu.CompilerParams(
            dimension_semantics=("parallel", "parallel")),
    )(x, wp, b2)
    return jnp.transpose(out, (0, 3, 1, 2))                             # -> NCHW


# ---------------------------------------------------------------------------
# Deterministic parameter init (mirrors conv3x3 / default_initializer:
# fan_avg uniform variance scaling with scale=1, zero bias).  OIHW like PyTorch.
# ---------------------------------------------------------------------------
def init_conv3x3_params(key, in_ch, out_ch):
    shape = (out_ch, in_ch, 3, 3)
    fan_in = in_ch * 9
    fan_out = out_ch * 9
    variance = 1.0 / ((fan_in + fan_out) / 2.0)
    limit = np.sqrt(3.0 * variance)
    w = jax.random.uniform(key, shape, jnp.float32, minval=-limit, maxval=limit)
    b = jnp.zeros((out_ch,), jnp.float32)
    return w, b


# ---------------------------------------------------------------------------
# Pure-JAX reference for correctness checking
# ---------------------------------------------------------------------------
def _reference(x_nchw, w=None, b=None, with_conv=False):
    h = jnp.repeat(jnp.repeat(x_nchw, 2, axis=2), 2, axis=3)
    if with_conv:
        h = jax.lax.conv_general_dilated(
            h, w, window_strides=(1, 1), padding=((1, 1), (1, 1)),
            dimension_numbers=("NCHW", "OIHW", "NCHW"))
        h = h + b[None, :, None, None]
    return h


if __name__ == "__main__":
    key = jax.random.PRNGKey(0)
    k_x, k_w = jax.random.split(key)

    B, C, H, W = 2, 4, 16, 16
    out_ch = 8
    x = jax.random.normal(k_x, (B, C, H, W), jnp.float32)
    weight, bias = init_conv3x3_params(k_w, C, out_ch)

    # with_conv=False (module default): pure nearest 2x upsample, NCHW kernel.
    y0 = upsamplepp_forward(x, with_conv=False)
    jax.block_until_ready(y0)
    ref0 = _reference(x, with_conv=False)
    assert y0.shape == (B, C, 2 * H, 2 * W)
    np.testing.assert_allclose(np.asarray(y0), np.asarray(ref0),
                               rtol=1e-5, atol=1e-5)

    # with_conv=True: fused upsample + 3x3 conv, single row tile (R=1).
    y1 = upsamplepp_forward(x, weight, bias, with_conv=True)
    jax.block_until_ready(y1)
    ref1 = _reference(x, weight, bias, with_conv=True)
    assert y1.shape == (B, out_ch, 2 * H, 2 * W)
    np.testing.assert_allclose(np.asarray(y1), np.asarray(ref1),
                               rtol=1e-4, atol=1e-4)

    # with_conv=True with explicit row tiling (R=2) to exercise the halo path.
    y1t = upsamplepp_forward(x, weight, bias, with_conv=True, row_tile=8)
    jax.block_until_ready(y1t)
    np.testing.assert_allclose(np.asarray(y1t), np.asarray(ref1),
                               rtol=1e-4, atol=1e-4)

    print("KERNEL_OK")
</pallas_src>

<mosaic_0001>
module attributes {stable_mosaic.version = 11 : i64} {
  func.func @_upsample_only_kernel(%arg0: i32, %arg1: i32, %arg2: memref<1x4x16x16xf32, #tpu.memory_space<vmem>>, %arg3: memref<16x32xf32, #tpu.memory_space<vmem>>, %arg4: memref<1x4x32x32xf32, #tpu.memory_space<vmem>>) attributes {dimension_semantics = [#tpu.dimension_semantics<parallel>, #tpu.dimension_semantics<parallel>], iteration_bounds = array<i64: 2, 1>, scalar_prefetch = 0 : i64, scratch_operands = 0 : i64, tpu.core_type = #tpu.core_type<tc>, window_params = [{transform_indices = @transform_0, window_bounds = array<i64: 1, 4, 16, 16>}, {pipeline_mode = #tpu.pipeline_mode<synchronous>, transform_indices = @transform_1, window_bounds = array<i64: 16, 32>}, {transform_indices = @transform_2, window_bounds = array<i64: 1, 4, 32, 32>}]} {
    %c0 = arith.constant 0 : index
    %c0_0 = arith.constant 0 : index
    %c0_1 = arith.constant 0 : index
    %c0_2 = arith.constant 0 : index
    %0 = vector.load %arg2[%c0, %c0_0, %c0_1, %c0_2] : memref<1x4x16x16xf32, #tpu.memory_space<vmem>>, vector<1x4x16x16xf32>
    %1 = vector.shape_cast %0 : vector<1x4x16x16xf32> to vector<4x16x16xf32>
    %2 = vector.shape_cast %1 : vector<4x16x16xf32> to vector<4x16x1x16xf32>
    %3 = vector.shape_cast %2 : vector<4x16x1x16xf32> to vector<4x16x1x16xf32>
    %4 = vector.broadcast %3 : vector<4x16x1x16xf32> to vector<4x16x2x16xf32>
    %5 = vector.shape_cast %4 : vector<4x16x2x16xf32> to vector<4x32x16xf32>
    %6 = vector.shape_cast %5 : vector<4x32x16xf32> to vector<128x16xf32>
    %c0_3 = arith.constant 0 : index
    %c0_4 = arith.constant 0 : index
    %7 = vector.load %arg3[%c0_3, %c0_4] : memref<16x32xf32, #tpu.memory_space<vmem>>, vector<16x32xf32>
    %cst = arith.constant dense<0.000000e+00> : vector<128x32xf32>
    %8 = tpu.matmul %6, %7, %cst {dimension_numbers = #tpu.dot_dimension_numbers<[1], [0], [0], [1], [0, 0, 1, 1], [], []>} : vector<128x16xf32>, vector<16x32xf32>, vector<128x32xf32> -> vector<128x32xf32>
    %9 = vector.shape_cast %8 : vector<128x32xf32> to vector<4x32x32xf32>
    %c0_5 = arith.constant 0 : index
    %c0_6 = arith.constant 0 : index
    %c0_7 = arith.constant 0 : index
    %c0_8 = arith.constant 0 : index
    %10 = vector.load %arg4[%c0_5, %c0_6, %c0_7, %c0_8] : memref<1x4x32x32xf32, #tpu.memory_space<vmem>>, vector<1x4x32x32xf32>
    %11 = vector.shape_cast %10 : vector<1x4x32x32xf32> to vector<4x32x32xf32>
    %12 = vector.shape_cast %9 : vector<4x32x32xf32> to vector<1x4x32x32xf32>
    tpu.vector_store %arg4[%c0_5, %c0_6, %c0_7, %c0_8], %12 {strides = array<i32>} : memref<1x4x32x32xf32, #tpu.memory_space<vmem>>, vector<1x4x32x32xf32>,
    return
  }
  func.func @transform_0(%arg0: i32, %arg1: i32) -> (i32, i32, i32, i32) {
    %c0_i32 = arith.constant 0 : i32
    %c0_i32_0 = arith.constant 0 : i32
    %c0_i32_1 = arith.constant 0 : i32
    return %arg0, %arg1, %c0_i32, %c0_i32_0 : i32, i32, i32, i32
  }
  func.func @transform_1(%arg0: i32, %arg1: i32) -> (i32, i32) {
    %c0_i32 = arith.constant 0 : i32
    %c0_i32_0 = arith.constant 0 : i32
    %c0_i32_1 = arith.constant 0 : i32
    return %c0_i32, %c0_i32_0 : i32, i32
  }
  func.func @transform_2(%arg0: i32, %arg1: i32) -> (i32, i32, i32, i32) {
    %c0_i32 = arith.constant 0 : i32
    %c0_i32_0 = arith.constant 0 : i32
    %c0_i32_1 = arith.constant 0 : i32
    return %arg0, %arg1, %c0_i32, %c0_i32_0 : i32, i32, i32, i32
  }
}

</mosaic_0001>

<bundles_post_ra>
// kernel: tpu_custom_call.1
= control target key start
LH: loop header
LB: loop body
LE: loop exit
PB: predicated region body
PF: predicated region fallthrough
CT: control target
= control target key end

     0   :  { %7 = vsyncpa [#allocation3], 0  ;;  %s2261_s0 = inlined_call_operand.hbm [shape: f32[2,4,16,16], index: 0, kind: input, shape index: {}]   ;;  %s2262_s1 = inlined_call_operand.hbm [shape: f32[16,32], index: 1, kind: input, shape index: {}]   ;;  %s2263_s2 = inlined_call_operand.hbm [shape: f32[2,4,32,32], index: 2, kind: output, shape index: {}]  }
   0x1   :  { %9 = vsyncpa [#allocation3 + $0x1], 0 }
   0x2   :  { %10 = vsyncpa [#allocation6], 0 }
   0x3   :  { %11 = vsyncpa [#allocation4], 0 }
   0x4   :  { %13 = vsyncpa [#allocation4 + $0x1], 0  ;;  %s1789_s9 = smov 0   ;;  %s1791_s10 = smov 0  }
   0x5   :  { %s1793_s11 = smov 0   ;;  %s1795_s12 = smov 0  }
   0x6   :  { %s1797_s13 = smov 0   ;;  %s1799_s14 = smov 0  }
   0x7 LB: > { %s1445_s15 = sadd.s32 4294967295, %s1763_s14   ;;  %s1446_s16 = sadd.s32 4294967294, %s1763_s14   ;;  %s1763_s14 = sphi %s1799_s14, %s19_s14   ;;  %s1759_s13 = sphi %s1797_s13, %s2287_s13   ;;  %s1755_s12 = sphi %s1795_s12, %s2286_s12   ;;  %s1751_s11 = sphi %s1793_s11, %s2285_s11   ;;  %s1747_s10 = sphi %s1791_s10, %s2284_s10   ;;  %s1743_s9 = sphi %s1789_s9, %s2283_s9  }
   0x8   : > { %p53_p0 = scmp.ne.s32.totalorder %s1747_s10, %s1743_s9  ;;  %p1823_p1 = scmp.eq.s32.totalorder %s1445_s15, 0 }
   0x9   : > { %p1827_p2 = scmp.eq.s32.totalorder %s1445_s15, 1  ;;  %p106_p3 = scmp.eq.s32.totalorder %s1446_s16, 1 }
   0xa   : > { %s2268_s17 = scalar_select %p1823_p1, 1, 0 }
   0xb   : > { %s2269_s18 = scalar_select %p1827_p2, 1, 0 }
   0xc   : > { %p1833_p4 = por %p1823_p1, %p53_p0  ;;  %p1447_p5 = scmp.ge.s32.totalorder %s1763_s14, 1 }
   0xd   : > { %p1838_p6 = por %p106_p3, %p53_p0  ;;  %p113_p7 = scmp.lt.s32.totalorder %s1763_s14, 3 }
   0xe   : > { %s2270_s19 = scalar_select %p1833_p4, 1, 0 }
   0xf   : > { %s2271_s20 = scalar_select %p1838_p6, 1, 0 }
  0x10   : > { %p1843_p8 = pnand %p1447_p5, %p113_p7  ;;  %s1765_s22 = smov [#allocation5]  }
  0x11   : > { %s125_s23 = sshll.u32 %s1765_s22, 4  ;;  %s31_s25 = sadd.s32 1, %s1759_s13  ;;  %s126_s23 = int_to_ptr.vmem [resolvable:$true] %s125_s23 }
  0x12   : > { %s2272_s21 = scalar_select %p1843_p8, 1, 0 }
  0x13   : > { %p1540_p9 = pneg %p1843_p8  ;;  %s1619_s28 = scalar_lea.hbm %s2262_s1, 256 }
  0x14   : > { %p1620_p12 = scmp.ne.s32.totalorder %s2262_s1, %s1619_s28  ;;  %p1626_p5 = scmp.lt.u32.totalorder %s1619_s28, %s2262_s1 }
  0x15   : > { %p1852_p11 = pnand %p1540_p9, %p1823_p1 }
  0x17   : > { %p1621_p13 = pneg %p1852_p11 }
  0x19   : > { %p1622_p0 = pnand %p1621_p13, %p1620_p12 }
  0x1b   : > { %p1623_p3 = pneg %p1622_p0 }
  0x1d   : > { %p1628_p7 = pnand %p1626_p5, %p1623_p3 }
  0x1f   : > { %1631 = shalt.err (!%p1628_p7)
}
  0x20   : > { %s1632_s5 = scalar_lea.vmem %s126_s23, 256  ;;  %p1640_p1 = scmp.lt.s32.totalorder %s126_s23, %s126_s23 }
  0x21   : > { %p1633_p9 = scmp.ne.s32.totalorder %s126_s23, %s1632_s5  ;;  %p1641_p4 = scmp.lt.s32.totalorder %s1632_s5, %s1632_s5 }
  0x23   : > { %p1635_p10 = pnand %p1633_p9, %p1621_p13  ;;  %p1642_p8 = por %p1641_p4, %p1640_p1 }
  0x25   : > { %p1636_p6 = pneg %p1635_p10 }
  0x27   : > { %p1643_p2 = pnand %p1642_p8, %p1636_p6 }
  0x29   : > { %1646 = shalt.err (!%p1643_p2)
}
  0x2a   : > { %s1766_s6 = smov 128   ;;  %s1767_s7 = smov 8  }
  0x2b   : > { %1543 = dma.hbm_to_vmem [thread:$0]  (!%p1852_p11), %s2262_s1, 256, %s126_s23, [#allocation6], %s1766_s6, %s1766_s6, %s1767_s7  }
  0x2c   : > { %p33_p1 = scmp.ge.s32.totalorder %s31_s25, 2  ;;  %s40_s16 = sadd.s32 1, %s1751_s11 }
  0x2d   : > { %p47_p2 = scmp.ne.s32.totalorder %s1751_s11, %s1747_s10  ;;  %p48_p4 = scmp.eq.s32.totalorder %s1763_s14, 0 }
  0x2e   : > { %s2289_s25 = smov (%p33_p1, %s31_s25), 0  ;;  %p2275_p8 = scmp.ne.s32.totalorder %s2269_s18, 0 }
  0x2f   : > { %p1882_p6 = por %p48_p4, %p47_p2  ;;  %s35_s26 = ssub.s32 %s1759_s13, %s2289_s25 }
  0x30   : > { %p1888_p10 = por %p2275_p8, %p47_p2  ;;  %p1553_p12 = scmp.lt.s32.totalorder %s1763_s14, 2 }
  0x31   : > { %p38_p11 = scmp.eq.s32.totalorder %s35_s26, 0  ;;  %s139_s23 = sand.u32 1, %s1751_s11  }
  0x32   : > { %s1450_s27 = sshll.u32 %s139_s23, 6  ;;  %s1478_s29 = sshll.u32 %s1759_s13, 10 }
  0x33   : > { %s1897_s28 = scalar_select %p38_p11, %s1751_s11, %s40_s16  }
  0x34   : > { %s1903_s4 = scalar_lea.hbm %s2261_s0, %s1478_s29  ;;  %s143_s18 = scalar_lea.vmem [#allocation2], %s1450_s27 }
  0x35   : > { %s153_s5 = sshll.u32 %s143_s18, 4  ;;  %p1909_p13 = pnand %p1553_p12, %p1882_p6  ;;  %s1905_s5 = int_to_ptr.vmem [resolvable:$true] %s153_s5 }
  0x36   : > { %s1913_s15 = scalar_lea.sflag [#allocation3], %s139_s23  ;;  %s1647_s16 = scalar_lea.hbm %s1903_s4, 1024 }
  0x37   : > { %p1648_p0 = scmp.ne.s32.totalorder %s1903_s4, %s1647_s16  ;;  %p1649_p3 = pneg %p1909_p13 }
  0x38   : > { %s1652_s22 = scalar_lea.hbm %s2261_s0, 2048  ;;  %p1653_p9 = scmp.lt.u32.totalorder %s1903_s4, %s2261_s0 }
  0x39   : > { %p1650_p5 = pnand %p1649_p3, %p1648_p0  ;;  %p1654_p1 = scmp.lt.u32.totalorder %s1652_s22, %s1647_s16 }
  0x3a   : > { %p1656_p4 = scmp.lt.u32.totalorder %s1647_s16, %s1903_s4 }
  0x3b   : > { %p1651_p7 = pneg %p1650_p5  ;;  %p1655_p2 = por %p1654_p1, %p1653_p9 }
  0x3d   : > { %p1657_p6 = por %p1656_p4, %p1655_p2 }
  0x3f   : > { %p1658_p8 = pnand %p1657_p6, %p1651_p7 }
  0x41   : > { %1661 = shalt.err (!%p1658_p8)
}
  0x42   : > { %s1662_s23 = scalar_lea.vmem %s1905_s5, 1024  ;;  %s1768_s3 = smov [#allocation2]  }
  0x43   : > { %p1663_p12 = scmp.ne.s32.totalorder %s1905_s5, %s1662_s23  ;;  %s1667_s18 = sshll.u32 %s1768_s3, 4  ;;  %s1668_s18 = int_to_ptr.vmem [resolvable:$false] %s1667_s18 }
  0x44   : > { %s1669_s26 = scalar_lea.vmem %s1668_s18, 2048  ;;  %p1670_p5 = scmp.lt.s32.totalorder %s1905_s5, %s1668_s18 }
  0x45   : > { %p1665_p11 = pnand %p1663_p12, %p1649_p3  ;;  %p1671_p9 = scmp.lt.s32.totalorder %s1669_s26, %s1662_s23 }
  0x47   : > { %p1666_p0 = pneg %p1665_p11  ;;  %p1672_p1 = por %p1671_p9, %p1670_p5 }
  0x49   : > { %p1673_p2 = pnand %p1672_p1, %p1666_p0 }
  0x4b   : > { %1676 = shalt.err (!%p1673_p2)
}
  0x4c   : > { %1547 = dma.hbm_to_vmem [thread:$0]  (!%p1909_p13), %s1903_s4, 1024, %s1905_s5, %s1913_s15, %s1766_s6, %s1766_s6, %s1767_s7  }
  0x4d   : > { %p2278_p3 = scmp.ne.s32.totalorder %s2272_s21, 0 }
  0x4e   : > { %s1947_s16 = sand.u32 (!%p2278_p3), 1, %s1747_s10   ;;  %p2279_p7 = scmp.ne.s32.totalorder (!%p2278_p3), %s2270_s19, 0 }
  0x4f   : > { %165 = sbr.rel (%p2278_p3) target bundleno = 395 (0x18b), region = 28  ;;  %s1454_s27 = sshll.u32 (!%p2278_p3), %s1947_s16, 6 }
  0x50   : > { %s168_s22 = scalar_lea.sflag (!%p2278_p3), [#allocation3], %s1947_s16  ;;  %s1951_s29 = scalar_lea.vmem (!%p2278_p3), [#allocation2], %s1454_s27 }
  0x56   : > { %1730 = dma.done.wait (%p2279_p7), %s168_s22, 1024  }
  0x57   : > { %1732 = vsyncadd (%p2279_p7), %s168_s22, 4294966272  ;;  %p2280_p13 = scmp.ne.s32.totalorder %s2268_s17, 0 }
  0x59   : > { %1734 = dma.done.wait (%p2280_p13), [#allocation6], 256  }
  0x5a   : > { %1736 = vsyncadd (%p2280_p13), [#allocation6], 4294967040  ;;  %v218_v0 = vlaneseq  ;;  %v1769_v1 = vmov 1966171168   ;;  %v1770_v3 = vmov 1983009808  }
  0x5b   : > { %v216_v2 = vunpack.c.l.s4 %v1769_v1  ;;  %v867_v4 = vunpack.c.l.s4 %v1770_v3  ;;  %v862_v9 = vld [vmem:[#allocation5] sm:$0xff]  ;;  %v863_v10 = vld [vmem:[#allocation5 + $0x8] sm:$0xff]  ;;  %vm1136_vm0 = vcmask 130048   ;;  %s1456_s17 = sshll.u32 %s1947_s16, 7  ;;  %vm1314_vm1 = vcmask 261120   ;;  %s1479_s21 = sshll.u32 %s1755_s12, 11 }
  0x5c   : > { %v219_v5 = vshrl.u32 %v218_v0, 7  ;;  %v198_v11 = vld [vmem:[%s1951_s29] sm:$0xff]  ;;  %v1526_v13 = vpack.c.bf16 %v863_v10, %v862_v9  ;;  %v1971_v18 = vld [vmem:[%s1951_s29 + $0x8] sm:$0xff]  ;;  %s2171_s19 = scalar_lea.vmem [#allocation7], %s1456_s17  ;;  %s2202_s5 = scalar_lea.hbm %s2263_s2, %s1479_s21 }
  0x5d   : > { %v217_v6 = vunpack.c.0.s8 %v216_v2  ;;  %v868_v7 = vunpack.c.0.s8 %v867_v4  ;;  %v214_v14 = vcombine.high %v198_v11, %v198_v11  ;;  %v202_v17 = vld [vmem:[%s1951_s29 + $0x20] sm:$0xff]  ;;  %v1974_v19 = vld [vmem:[%s1951_s29 + $0x28] sm:$0xff]  ;;  %s1348_s6 = sshll.u32 %s2171_s19, 4  ;;  %s1332_s12 = scalar_lea.sflag [#allocation4], %s1947_s16  ;;  %s2204_s6 = int_to_ptr.vmem [resolvable:$true] %s1348_s6 }
  0x5e   : > { %v1964_v12 = vsub.s32 0, %v219_v5  ;;  %v410_v20 = vcombine.high %v202_v17, %v202_v17  ;;  %1527 = vmatprep.subr.bf16.mxu0 %v1526_v13  ;;  %1530 = vmatprep.subr.bf16.mxu1 %v1526_v13  ;;  %s1677_s8 = scalar_lea.vmem %s2204_s6, 2048  ;;  %s1771_s15 = smov [#allocation7]  }
  0x5f   : > { %v1961_v8 = vsub.s32 %v217_v6, %v219_v5  ;;  %v1967_v16 = vsub.s32 %v868_v7, %v219_v5  ;;  %1529 = vmatpush3.bf16.msra.mxu0 %v1526_v13  ;;  %1531 = vmatpush3.bf16.msra.mxu1 %v1526_v13  ;;  %p1678_p4 = scmp.ne.s32.totalorder %s2204_s6, %s1677_s8  ;;  %s1681_s30 = sshll.u32 %s1771_s15, 4  ;;  %s1682_s30 = int_to_ptr.vmem [resolvable:$false] %s1681_s30 }
  0x60   : > { %s1683_s23 = scalar_lea.vmem %s1682_s30, 4096  ;;  %p1684_p12 = scmp.lt.s32.totalorder %s2204_s6, %s1682_s30 }
  0x61   : > { %v221_v15 = vrot.slane %v198_v11, %v1961_v8  ;;  %v417_v21 = vrot.slane %v202_v17, %v1961_v8  ;;  %v270_v22 = vrot.slane %v1971_v18, %v1961_v8  ;;  %v1981_v23 = vrot.slane %v1974_v19, %v1961_v8  ;;  %p1679_p6 = pnand %p1678_p4, %p1888_p10  ;;  %p1685_p11 = scmp.lt.s32.totalorder %s1683_s23, %s1677_s8 }
  0x62   : > { %v228_v24 = vrot.slane %v214_v14, %v1961_v8  ;;  %v424_v27 = vrot.slane %v410_v20, %v1961_v8 }
  0x63   : > { %v229_v25 = vcombine.high %v221_v15, %v221_v15  ;;  %v237_v26 = vrot.slane %v221_v15, %v1961_v8  ;;  %v425_v28 = vcombine.high %v417_v21, %v417_v21  ;;  %v433_v29 = vrot.slane %v417_v21, %v1961_v8  ;;  %p1680_p8 = pneg %p1679_p6  ;;  %p1686_p0 = por %p1685_p11, %p1684_p12 }
  0x64   : > { %v230_v33 = vcombine.high %v228_v24, %v228_v24  ;;  %v244_v37 = vrot.slane %v228_v24, %v1961_v8  ;;  %v426_v57 = vcombine.high %v424_v27, %v424_v27  ;;  %v440_v61 = vrot.slane %v424_v27, %v1961_v8 }
  0x65   : > { %v251_v30 = vrot.slane %v229_v25, %v1961_v8  ;;  %v259_v31 = vcombine.high %v237_v26, %v237_v26  ;;  %v609_v32 = vrot.slane %v237_v26, %v1964_v12  ;;  %v447_v34 = vrot.slane %v425_v28, %v1961_v8  ;;  %p1687_p5 = pnand %p1686_p0, %p1680_p8 }
  0x66   : > { %v455_v35 = vcombine.high %v433_v29, %v433_v29  ;;  %v737_v36 = vrot.slane %v433_v29, %v1964_v12  ;;  %v258_v41 = vrot.slane %v230_v33, %v1961_v8  ;;  %v260_v45 = vcombine.high %v244_v37, %v244_v37 }
  0x67   : > { %v261_v38 = vcombine.high %v251_v30, %v251_v30  ;;  %v613_v39 = vrot.slane %v251_v30, %v1964_v12  ;;  %v617_v40 = vrot.slane %v259_v31, %v1964_v12  ;;  %v457_v42 = vcombine.high %v447_v34, %v447_v34 }
  0x68   : > { %v741_v43 = vrot.slane %v447_v34, %v1964_v12  ;;  %v745_v44 = vrot.slane %v455_v35, %v1964_v12  ;;  %v262_v48 = vcombine.high %v258_v41, %v258_v41  ;;  %v625_v49 = vrot.slane %v244_v37, %v1964_v12 }
  0x69   : > { %v621_v46 = vrot.slane %v261_v38, %v1964_v12  ;;  %v864_v47 = vcombine.low %v609_v32, %v613_v39  ;;  %v749_v50 = vrot.slane %v457_v42, %v1964_v12  ;;  %v629_v52 = vrot.slane %v258_v41, %v1964_v12 }
  0x6a   : > { %v1000_v51 = vcombine.low %v737_v36, %v741_v43  ;;  %v633_v53 = vrot.slane %v260_v45, %v1964_v12  ;;  %v637_v56 = vrot.slane %v262_v48, %v1964_v12  ;;  %v454_v0 = vrot.slane %v426_v57, %v1961_v8  ;;  %v2038_v43 = vld [vmem:[%s1951_s29 + $0x10] sm:$0xff] }
  0x6b   : > { %v865_v54 = vcombine.low %v617_v40, %v621_v46  ;;  %v872_v55 = vrot.slane %v864_v47, %v1967_v16  ;;  %v1001_v58 = vcombine.low %v745_v44, %v749_v50  ;;  %v881_v60 = vcombine.low %v625_v49, %v629_v52  ;;  %v2041_v44 = vld [vmem:[%s1951_s29 + $0x30] sm:$0xff] }
  0x6c   : > { %v1008_v59 = vrot.slane %v1000_v51, %v1967_v16  ;;  %v882_v63 = vcombine.low %v633_v53, %v637_v56  ;;  %v278_v1 = vcombine.high %v270_v22, %v270_v22  ;;  %v456_v4 = vcombine.high %v440_v61, %v440_v61 }
  0x6d   : > { %v879_v62 = vrot.slane %v865_v54, %v1967_v16  ;;  %v1015_v2 = vrot.slane %v1001_v58, %v1967_v16  ;;  %v889_v3 = vrot.slane %v881_v60, %v1967_v16  ;;  %v753_v5 = vrot.slane %v440_v61, %v1964_v12 }
  0x6e   : > { %v896_v7 = vrot.slane %v882_v63, %v1967_v16  ;;  %v458_v9 = vcombine.high %v454_v0, %v454_v0  ;;  %v757_v10 = vrot.slane %v454_v0, %v1964_v12  ;;  %v761_v13 = vrot.slane %v456_v4, %v1964_v12 }
  0x6f   : > { %v880_v6 = vcombine.low %v872_v55, %v879_v62  ;;  %v1016_v11 = vcombine.low %v1008_v59, %v1015_v2  ;;  %v286_v14 = vrot.slane %v270_v22, %v1961_v8  ;;  %v300_v15 = vrot.slane %v278_v1, %v1961_v8 }
  0x70   : > { %v897_v17 = vcombine.low %v889_v3, %v896_v7  ;;  %v765_v20 = vrot.slane %v458_v9, %v1964_v12  ;;  %v1017_v21 = vcombine.low %v753_v5, %v757_v10  ;;  %v474_v24 = vcombine.high %v1981_v23, %v1981_v23 }
  0x71   : > { %1502 = vmatprep.mubr.msk.f32.mxu0 %vm1136_vm0, %v880_v6  ;;  %1514 = vmatprep.mubr.msk.f32.mxu1 %vm1136_vm0, %v1016_v11  ;;  %v308_v25 = vcombine.high %v286_v14, %v286_v14  ;;  %v310_v26 = vcombine.high %v300_v15, %v300_v15  ;;  %v641_v27 = vrot.slane %v286_v14, %v1964_v12 }
  0x72   : > { %v645_v28 = vrot.slane %v300_v15, %v1964_v12  ;;  %1503 = vmatmul.mubr.msk.f32.vlgmr.msra.gmra.mrb[0].mxu0 %vm1136_vm0, %v897_v17  ;;  %v1018_v22 = vcombine.low %v761_v13, %v765_v20  ;;  %v1025_v29 = vrot.slane %v1017_v21, %v1967_v16  ;;  %v482_v30 = vrot.slane %v1981_v23, %v1961_v8 }
  0x73   : > { %v496_v31 = vrot.slane %v474_v24, %v1961_v8  ;;  %v649_v32 = vrot.slane %v308_v25, %v1964_v12  ;;  %v653_v33 = vrot.slane %v310_v26, %v1964_v12  ;;  %v263_v35 = vcombine.high %v1971_v18, %v1971_v18 }
  0x74   : > { %v898_v34 = vcombine.low %v641_v27, %v645_v28  ;;  %v1032_v36 = vrot.slane %v1018_v22, %v1967_v16  ;;  %v504_v37 = vcombine.high %v482_v30, %v482_v30  ;;  %v769_v39 = vrot.slane %v482_v30, %v1964_v12 }
  0x75   : > { %v506_v38 = vcombine.high %v496_v31, %v496_v31  ;;  %v899_v40 = vcombine.low %v649_v32, %v653_v33  ;;  %v773_v23 = vrot.slane %v496_v31, %v1964_v12  ;;  %v277_v42 = vrot.slane %v263_v35, %v1961_v8 }
  0x76   : > { %v906_v41 = vrot.slane %v898_v34, %v1967_v16  ;;  %v1033_v45 = vcombine.low %v1025_v29, %v1032_v36  ;;  %v777_v18 = vrot.slane %v504_v37, %v1964_v12  ;;  %v459_v47 = vcombine.high %v1974_v19, %v1974_v19 }
  0x77   : > { %v781_v46 = vrot.slane %v506_v38, %v1964_v12  ;;  %v913_v48 = vrot.slane %v899_v40, %v1967_v16  ;;  %v1034_v49 = vcombine.low %v769_v39, %v773_v23  ;;  %v279_v50 = vcombine.high %v277_v42, %v277_v42 }
  0x78   : > { %v293_v51 = vrot.slane %v277_v42, %v1961_v8  ;;  %1515 = vmatmul.mubr.msk.f32.vlgmr.msra.gmra.mrb[0].mxu1 %vm1136_vm0, %v1033_v45  ;;  %v473_v53 = vrot.slane %v459_v47, %v1961_v8  ;;  %v319_v54 = vrot.slane %v2038_v43, %v1961_v8  ;;  %v515_v55 = vrot.slane %v2041_v44, %v1961_v8 }
  0x79   : > { %v1035_v52 = vcombine.low %v777_v18, %v781_v46  ;;  %v914_v56 = vcombine.low %v906_v41, %v913_v48  ;;  %v1042_v19 = vrot.slane %v1034_v49, %v1967_v16  ;;  %v307_v57 = vrot.slane %v279_v50, %v1961_v8  ;;  %v2083_v41 = vld [vmem:[%s1951_s29 + $0x18] sm:$0xff] }
  0x7a   : > { %v309_v58 = vcombine.high %v293_v51, %v293_v51  ;;  %v657_v60 = vrot.slane %v293_v51, %v1964_v12  ;;  %v475_v61 = vcombine.high %v473_v53, %v473_v53  ;;  %v489_v62 = vrot.slane %v473_v53, %v1961_v8  ;;  %v2089_v46 = vld [vmem:[%s1951_s29 + $0x38] sm:$0xff] }
  0x7b   : > { %v1049_v59 = vrot.slane %v1035_v52, %v1967_v16  ;;  %1505 = vmatprep.mubr.msk.f32.mxu0 %vm1136_vm0, %v914_v56  ;;  %v311_v63 = vcombine.high %v307_v57, %v307_v57  ;;  %v661_v0 = vrot.slane %v307_v57, %v1964_v12  ;;  %v327_v2 = vcombine.high %v319_v54, %v319_v54 }
  0x7c   : > { %v665_v1 = vrot.slane %v309_v58, %v1964_v12  ;;  %v503_v4 = vrot.slane %v475_v61, %v1961_v8  ;;  %v505_v5 = vcombine.high %v489_v62, %v489_v62  ;;  %v785_v6 = vrot.slane %v489_v62, %v1964_v12 }
  0x7d   : > { %v1050_v3 = vcombine.low %v1042_v19, %v1049_v59  ;;  %v669_v7 = vrot.slane %v311_v63, %v1964_v12  ;;  %v915_v9 = vcombine.low %v657_v60, %v661_v0  ;;  %v335_v10 = vrot.slane %v319_v54, %v1961_v8 }
  0x7e   : > { %v349_v11 = vrot.slane %v327_v2, %v1961_v8  ;;  %v507_v13 = vcombine.high %v503_v4, %v503_v4  ;;  %v789_v14 = vrot.slane %v503_v4, %v1964_v12  ;;  %v793_v15 = vrot.slane %v505_v5, %v1964_v12 }
  0x7f   : > { %1517 = vmatprep.mubr.msk.f32.mxu1 %vm1136_vm0, %v1050_v3  ;;  %v523_v17 = vcombine.high %v515_v55, %v515_v55  ;;  %v916_v20 = vcombine.low %v665_v1, %v669_v7  ;;  %v923_v21 = vrot.slane %v915_v9, %v1967_v16  ;;  %v357_v24 = vcombine.high %v335_v10, %v335_v10 }
  0x80   : > { %v359_v25 = vcombine.high %v349_v11, %v349_v11  ;;  %v797_v26 = vrot.slane %v507_v13, %v1964_v12  ;;  %v1051_v27 = vcombine.low %v785_v6, %v789_v14  ;;  %v673_v28 = vrot.slane %v335_v10, %v1964_v12 }
  0x81   : > { %v677_v22 = vrot.slane %v349_v11, %v1964_v12  ;;  %v930_v29 = vrot.slane %v916_v20, %v1967_v16  ;;  %v681_v30 = vrot.slane %v357_v24, %v1964_v12  ;;  %v531_v32 = vrot.slane %v515_v55, %v1961_v8 }
  0x82   : > { %v685_v31 = vrot.slane %v359_v25, %v1964_v12  ;;  %v1052_v33 = vcombine.low %v793_v15, %v797_v26  ;;  %v1059_v34 = vrot.slane %v1051_v27, %v1967_v16  ;;  %v545_v36 = vrot.slane %v523_v17, %v1961_v8 }
  0x83   : > { %v932_v35 = vcombine.low %v673_v28, %v677_v22  ;;  %v931_v37 = vcombine.low %v923_v21, %v930_v29  ;;  %v553_v39 = vcombine.high %v531_v32, %v531_v32  ;;  %v801_v40 = vrot.slane %v531_v32, %v1964_v12 }
  0x84   : > { %v933_v38 = vcombine.low %v681_v30, %v685_v31  ;;  %v1066_v23 = vrot.slane %v1052_v33, %v1967_v16  ;;  %v555_v45 = vcombine.high %v545_v36, %v545_v36  ;;  %v805_v18 = vrot.slane %v545_v36, %v1964_v12 }
  0x85   : > { %v940_v42 = vrot.slane %v932_v35, %v1967_v16  ;;  %1506 = vmatmul.mubr.msk.f32.gmra.mrb[2].mxu0 %vm1136_vm0, %v931_v37  ;;  %v809_v48 = vrot.slane %v553_v39, %v1964_v12  ;;  %v312_v49 = vcombine.high %v2038_v43, %v2038_v43  ;;  %v508_v50 = vcombine.high %v2041_v44, %v2041_v44 }
  0x86   : > { %v947_v47 = vrot.slane %v933_v38, %v1967_v16  ;;  %v1067_v51 = vcombine.low %v1059_v34, %v1066_v23  ;;  %v813_v52 = vrot.slane %v555_v45, %v1964_v12  ;;  %v1068_v53 = vcombine.low %v801_v40, %v805_v18 }
  0x87   : > { %v368_v54 = vrot.slane %v2083_v41, %v1961_v8  ;;  %v326_v56 = vrot.slane %v312_v49, %v1961_v8  ;;  %v522_v19 = vrot.slane %v508_v50, %v1961_v8  ;;  %v564_v57 = vrot.slane %v2089_v46, %v1961_v8 }
  0x88   : > { %v948_v55 = vcombine.low %v940_v42, %v947_v47  ;;  %1518 = vmatmul.mubr.msk.f32.gmra.mrb[2].mxu1 %vm1136_vm0, %v1067_v51  ;;  %v1069_v43 = vcombine.low %v809_v48, %v813_v52  ;;  %v1076_v44 = vrot.slane %v1068_v53, %v1967_v16  ;;  %v361_v51 = vcombine.high %v2083_v41, %v2083_v41 }
  0x89   : > { %v376_v58 = vcombine.high %v368_v54, %v368_v54  ;;  %v384_v59 = vrot.slane %v368_v54, %v1961_v8  ;;  %v328_v60 = vcombine.high %v326_v56, %v326_v56  ;;  %v342_v61 = vrot.slane %v326_v56, %v1961_v8 }
  0x8a   : > { %1508 = vmatprep.mubr.msk.f32.mxu0 %vm1136_vm0, %v948_v55  ;;  %v524_v62 = vcombine.high %v522_v19, %v522_v19  ;;  %v538_v63 = vrot.slane %v522_v19, %v1961_v8  ;;  %v1083_v0 = vrot.slane %v1069_v43, %v1967_v16  ;;  %v572_v32 = vcombine.high %v564_v57, %v564_v57 }
  0x8b   : > { %v398_v1 = vrot.slane %v376_v58, %v1961_v8  ;;  %v406_v2 = vcombine.high %v384_v59, %v384_v59  ;;  %v705_v3 = vrot.slane %v384_v59, %v1964_v12  ;;  %v356_v4 = vrot.slane %v328_v60, %v1961_v8 }
  0x8c   : > { %v358_v5 = vcombine.high %v342_v61, %v342_v61  ;;  %v689_v6 = vrot.slane %v342_v61, %v1964_v12  ;;  %v552_v7 = vrot.slane %v524_v62, %v1961_v8  ;;  %v1084_v9 = vcombine.low %v1076_v44, %v1083_v0 }
  0x8d   : > { %v554_v10 = vcombine.high %v538_v63, %v538_v63  ;;  %v817_v11 = vrot.slane %v538_v63, %v1964_v12  ;;  %v408_v13 = vcombine.high %v398_v1, %v398_v1  ;;  %v360_v14 = vcombine.high %v356_v4, %v356_v4 }
  0x8e   : > { %v693_v15 = vrot.slane %v356_v4, %v1964_v12  ;;  %v697_v17 = vrot.slane %v358_v5, %v1964_v12  ;;  %v556_v20 = vcombine.high %v552_v7, %v552_v7  ;;  %1520 = vmatprep.mubr.msk.f32.mxu1 %vm1136_vm0, %v1084_v9  ;;  %v821_v21 = vrot.slane %v552_v7, %v1964_v12 }
  0x8f   : > { %v825_v24 = vrot.slane %v554_v10, %v1964_v12  ;;  %v709_v25 = vrot.slane %v398_v1, %v1964_v12  ;;  %v713_v26 = vrot.slane %v406_v2, %v1964_v12  ;;  %v701_v27 = vrot.slane %v360_v14, %v1964_v12 }
  0x90   : > { %v949_v28 = vcombine.low %v689_v6, %v693_v15  ;;  %v829_v22 = vrot.slane %v556_v20, %v1964_v12  ;;  %v717_v29 = vrot.slane %v408_v13, %v1964_v12  ;;  %v1085_v30 = vcombine.low %v817_v11, %v821_v21 }
  0x91   : > { %v966_v31 = vcombine.low %v705_v3, %v709_v25  ;;  %v580_v33 = vrot.slane %v564_v57, %v1961_v8  ;;  %v950_v34 = vcombine.low %v697_v17, %v701_v27  ;;  %v594_v40 = vrot.slane %v572_v32, %v1961_v8 }
  0x92   : > { %v957_v35 = vrot.slane %v949_v28, %v1967_v16  ;;  %v1086_v36 = vcombine.low %v825_v24, %v829_v22  ;;  %v967_v37 = vcombine.low %v713_v26, %v717_v29  ;;  %v1093_v38 = vrot.slane %v1085_v30, %v1967_v16 }
  0x93   : > { %v974_v39 = vrot.slane %v966_v31, %v1967_v16  ;;  %v602_v23 = vcombine.high %v580_v33, %v580_v33  ;;  %v964_v42 = vrot.slane %v950_v34, %v1967_v16  ;;  %v833_v47 = vrot.slane %v580_v33, %v1964_v12 }
  0x94   : > { %v1100_v45 = vrot.slane %v1086_v36, %v1967_v16  ;;  %v981_v18 = vrot.slane %v967_v37, %v1967_v16  ;;  %v604_v48 = vcombine.high %v594_v40, %v594_v40  ;;  %v837_v49 = vrot.slane %v594_v40, %v1964_v12 }
  0x95   : > { %v841_v50 = vrot.slane %v602_v23, %v1964_v12  ;;  %v965_v52 = vcombine.low %v957_v35, %v964_v42  ;;  %v557_v55 = vcombine.high %v2089_v46, %v2089_v46  ;;  %v375_v57 = vrot.slane %v361_v51, %v1961_v8 }
  0x96   : > { %v1101_v53 = vcombine.low %v1093_v38, %v1100_v45  ;;  %v982_v54 = vcombine.low %v974_v39, %v981_v18  ;;  %v845_v56 = vrot.slane %v604_v48, %v1964_v12  ;;  %v1102_v19 = vcombine.low %v833_v47, %v837_v49 }
  0x97   : > { %1509 = vmatmul.mubr.msk.f32.gmra.mrb[4].mxu0 %vm1136_vm0, %v965_v52  ;;  %v571_v43 = vrot.slane %v557_v55, %v1961_v8  ;;  %v377_v58 = vcombine.high %v375_v57, %v375_v57  ;;  %v391_v59 = vrot.slane %v375_v57, %v1961_v8 }
  0x98   : > { %1521 = vmatmul.mubr.msk.f32.gmra.mrb[4].mxu1 %vm1136_vm0, %v1101_v53  ;;  %1511 = vmatprep.mubr.msk.f32.mxu0 %vm1136_vm0, %v982_v54  ;;  %v1103_v41 = vcombine.low %v841_v50, %v845_v56  ;;  %v1110_v44 = vrot.slane %v1102_v19, %v1967_v16 }
  0x99   : > { %v573_v46 = vcombine.high %v571_v43, %v571_v43  ;;  %v587_v60 = vrot.slane %v571_v43, %v1961_v8  ;;  %v405_v62 = vrot.slane %v377_v58, %v1961_v8  ;;  %v407_v63 = vcombine.high %v391_v59, %v391_v59 }
  0x9a   : > { %v1117_v61 = vrot.slane %v1103_v41, %v1967_v16  ;;  %v721_v0 = vrot.slane %v391_v59, %v1964_v12 }
  0x9b   : > { %v601_v1 = vrot.slane %v573_v46, %v1961_v8  ;;  %v603_v2 = vcombine.high %v587_v60, %v587_v60  ;;  %v849_v3 = vrot.slane %v587_v60, %v1964_v12  ;;  %v409_v5 = vcombine.high %v405_v62, %v405_v62 }
  0x9c   : > { %v1118_v4 = vcombine.low %v1110_v44, %v1117_v61  ;;  %v725_v6 = vrot.slane %v405_v62, %v1964_v12  ;;  %v729_v7 = vrot.slane %v407_v63, %v1964_v12 }
  0x9d   : > { %v605_v9 = vcombine.high %v601_v1, %v601_v1  ;;  %v853_v10 = vrot.slane %v601_v1, %v1964_v12  ;;  %v857_v11 = vrot.slane %v603_v2, %v1964_v12  ;;  %v733_v13 = vrot.slane %v409_v5, %v1964_v12 }
  0x9e   : > { %1523 = vmatprep.mubr.msk.f32.mxu1 %vm1136_vm0, %v1118_v4  ;;  %v983_v8 = vcombine.low %v721_v0, %v725_v6 }
  0x9f   : > { %v861_v14 = vrot.slane %v605_v9, %v1964_v12  ;;  %v1119_v15 = vcombine.low %v849_v3, %v853_v10  ;;  %v984_v17 = vcombine.low %v729_v7, %v733_v13 }
  0xa0   : > { %v991_v20 = vrot.slane %v983_v8, %v1967_v16 }
  0xa1   : > { %v1120_v21 = vcombine.low %v857_v11, %v861_v14  ;;  %v1127_v24 = vrot.slane %v1119_v15, %v1967_v16  ;;  %v998_v25 = vrot.slane %v984_v17, %v1967_v16 }
  0xa3   : > { %v1134_v26 = vrot.slane %v1120_v21, %v1967_v16  ;;  %v999_v27 = vcombine.low %v991_v20, %v998_v25 }
  0xa5   : > { %v1135_v28 = vcombine.low %v1127_v24, %v1134_v26  ;;  %1512 = vmatmul.mubr.msk.f32.gmra.mrb[6].mxu0 %vm1136_vm0, %v999_v27 }
  0xa7   : > { %1524 = vmatmul.mubr.msk.f32.gmra.mrb[6].mxu1 %vm1136_vm0, %v1135_v28 }
 0x145   : > { %v1504_v12 = vpop.f32.mrb[0].mxu0 }
 0x146   : > { %1316 = vst.msk [vmem:[%s2171_s19 + $0x8] sm:$0xff] %vm1314_vm1, %v1504_v12  ;;  %v1235_v16 = vpop.f32.mrb[1].mxu0 }
 0x147   : > { %1315 = vst.msk [vmem:[%s2171_s19] sm:$0xff] %vm1314_vm1, %v1235_v16 }
 0x14b   : > { %v1516_v22 = vpop.f32.mrb[0].mxu1 }
 0x14c   : > { %1324 = vst.msk [vmem:[%s2171_s19 + $0x48] sm:$0xff] %vm1314_vm1, %v1516_v22  ;;  %v1275_v29 = vpop.f32.mrb[1].mxu1 }
 0x14d   : > { %1323 = vst.msk [vmem:[%s2171_s19 + $0x40] sm:$0xff] %vm1314_vm1, %v1275_v29 }
 0x158   : > { %v1507_v30 = vpop.f32.mrb[2].mxu0 }
 0x159   : > { %1318 = vst.msk [vmem:[%s2171_s19 + $0x18] sm:$0xff] %vm1314_vm1, %v1507_v30  ;;  %v1245_v31 = vpop.f32.mrb[3].mxu0 }
 0x15a   : > { %1317 = vst.msk [vmem:[%s2171_s19 + $0x10] sm:$0xff] %vm1314_vm1, %v1245_v31 }
 0x15b   : > { %v1519_v32 = vpop.f32.mrb[2].mxu1 }
 0x15c   : > { %1326 = vst.msk [vmem:[%s2171_s19 + $0x58] sm:$0xff] %vm1314_vm1, %v1519_v32  ;;  %v1285_v33 = vpop.f32.mrb[3].mxu1 }
 0x15d   : > { %1325 = vst.msk [vmem:[%s2171_s19 + $0x50] sm:$0xff] %vm1314_vm1, %v1285_v33 }
 0x16a   : > { %v1510_v34 = vpop.f32.mrb[4].mxu0 }
 0x16b   : > { %v1522_v35 = vpop.f32.mrb[4].mxu1  ;;  %1320 = vst.msk [vmem:[%s2171_s19 + $0x28] sm:$0xff] %vm1314_vm1, %v1510_v34  ;;  %v1255_v36 = vpop.f32.mrb[5].mxu0 }
 0x16c   : > { %1328 = vst.msk [vmem:[%s2171_s19 + $0x68] sm:$0xff] %vm1314_vm1, %v1522_v35  ;;  %v1295_v37 = vpop.f32.mrb[5].mxu1  ;;  %1319 = vst.msk [vmem:[%s2171_s19 + $0x20] sm:$0xff] %vm1314_vm1, %v1255_v36 }
 0x16d   : > { %1327 = vst.msk [vmem:[%s2171_s19 + $0x60] sm:$0xff] %vm1314_vm1, %v1295_v37 }
 0x178   : > { %v1513_v38 = vpop.f32.mrb[6].mxu0 }
 0x179   : > { %1322 = vst.msk [vmem:[%s2171_s19 + $0x38] sm:$0xff] %vm1314_vm1, %v1513_v38  ;;  %v1265_v40 = vpop.f32.mrb[7].mxu0 }
 0x17a   : > { %v1525_v39 = vpop.f32.mrb[6].mxu1  ;;  %1321 = vst.msk [vmem:[%s2171_s19 + $0x30] sm:$0xff] %vm1314_vm1, %v1265_v40 }
 0x17b   : > { %1330 = vst.msk [vmem:[%s2171_s19 + $0x78] sm:$0xff] %vm1314_vm1, %v1525_v39  ;;  %v1305_v23 = vpop.f32.mrb[7].mxu1 }
 0x17c   : > { %1329 = vst.msk [vmem:[%s2171_s19 + $0x70] sm:$0xff] %vm1314_vm1, %v1305_v23 }
 0x17d   : > { %1690 = shalt.err (!%p1687_p5)
}
 0x17e   : > { %s1691_s3 = scalar_lea.hbm %s2202_s5, 2048  ;;  %s1695_s27 = scalar_lea.hbm %s2263_s2, 4096 }
 0x17f   : > { %p1692_p9 = scmp.ne.s32.totalorder %s2202_s5, %s1691_s3  ;;  %p1696_p3 = scmp.lt.u32.totalorder %s2202_s5, %s2263_s2 }
 0x180   : > { %p1697_p7 = scmp.lt.u32.totalorder %s1695_s27, %s1691_s3  ;;  %p1699_p4 = scmp.lt.u32.totalorder %s1691_s3, %s2202_s5 }
 0x181   : > { %p1693_p1 = pnand %p1692_p9, %p1888_p10 }
 0x182   : > { %p1698_p13 = por %p1697_p7, %p1696_p3 }
 0x183   : > { %p1694_p2 = pneg %p1693_p1 }
 0x184   : > { %p1700_p6 = por %p1699_p4, %p1698_p13 }
 0x186   : > { %p1701_p8 = pnand %p1700_p6, %p1694_p2 }
 0x188   : > { %1704 = shalt.err (!%p1701_p8)
}
 0x189   : > { %s1772_s17 = smov 128   ;;  %s1773_s19 = smov 8  }
 0x18a   : > { %1538 = dma.vmem_to_hbm [thread:$0]  (%p1888_p10), %s2204_s6, 2048, %s2202_s5, %s1332_s12, %s1772_s17, %s1772_s17, %s1773_s19  }
 0x18b PF: > { %s1363_s21 = sand.u32 1, %s1743_s9   ;;  %p2281_p12 = scmp.ne.s32.totalorder %s2271_s20, 0 }
 0x18c   : > { %p2282_p11 = scmp.ge.s32.totalorder %s1763_s14, 2  ;;  %s1364_s7 = scalar_lea.sflag [#allocation4], %s1363_s21 }
 0x18e   : > { %p1549_p0 = pnand %p2282_p11, %p2281_p12 }
 0x190   : > { %1738 = dma.done.wait (!%p1549_p0), %s1364_s7, 2048  }
 0x191   : > { %1740 = vsyncadd (!%p1549_p0), %s1364_s7, 4294965248  ;;  %s19_s14 = sadd.s32 1, %s1763_s14   ;;  %s2283_s9 = smov %s1747_s10 }
 0x192   : > { %p16_p5 = scmp.ge.s32.totalorder %s19_s14, 4   ;;  %s2284_s10 = smov %s1751_s11 }
 0x193   : > { %s2285_s11 = smov %s1897_s28  ;;  %s2286_s12 = smov %s1759_s13 }
 0x194   : > { %s2287_s13 = smov %s2289_s25  ;;  %18 = sbr.rel (!%p16_p5) target bundleno = 7 (0x7), region = 77 }
 0x19b   :  { %1369 = vsyncpa [#allocation3], 1 }
 0x19c   :  { %1371 = vsyncpa [#allocation3 + $0x1], 1 }
 0x19d   :  { %1372 = vsyncpa [#allocation6], 1 }
 0x19e   :  { %1373 = vsyncpa [#allocation4], 1 }
 0x19f   :  { %1375 = vsyncpa [#allocation4 + $0x1], 1 }

</bundles_post_ra>
